<compile_context>
chip_gen: v5e
topology: v5e:2x2
jax: 0.10.0
libtpu: 0.0.40
codegen_flags: <defaults>
</compile_context>

<pallas_src>
import functools
import numpy as np
import jax
import jax.numpy as jnp
from jax.experimental import pallas as pl
from jax.experimental.pallas import tpu as pltpu


def _eq_conv_kernel(x_ref, w_ref, b_ref, o_ref, xpad_ref, *,
                    KH, KW, H, W, Hout, Wout, Wp, Cin, pad, B_blk, mxu_bf16):
    # x_ref    : (B_blk, Cin, H*W)          lane-dense NCHW input block (unpadded)
    # w_ref    : (Cout, K)                  weights * c, K ordered (kh, kw, ci)
    # b_ref    : (Cout, 1)                  bias
    # o_ref    : (B_blk, Cout, Hout*Wout)   NCHW-flat output block (lane-dense M)
    # xpad_ref : (B_blk, Cin, Hp*Wp+KW-1)   VMEM scratch: row-flattened padded image
    M = Hout * Wout           # valid output columns per image
    MW = Hout * Wp            # matmul columns per image (incl. KW-1 garbage cols/row)

    # --- zero-pad inside VMEM (padded tensor never touches HBM) --------------
    # Re-zero every step: under dimension_semantics=('parallel',) a core may
    # never execute grid step 0, so a program_id==0-guarded init would be unsafe.
    xpad_ref[...] = jnp.zeros_like(xpad_ref)
    for h in range(H):                                     # static unroll
        dst = (pad + h) * Wp + pad
        xpad_ref[:, :, dst:dst + W] = x_ref[:, :, h * W:(h + 1) * W]

    # --- im2col: each (kh, kw) tap is one contiguous lane window --------------
    patches = []
    for b in range(B_blk):                                 # static unroll
        taps = [xpad_ref[b, :, kh * Wp + kw: kh * Wp + kw + MW]     # (Cin, MW)
                for kh in range(KH) for kw in range(KW)]
        patches.append(jnp.concatenate(taps, axis=0))                # (K, MW)
    patch = patches[0] if B_blk == 1 else jnp.concatenate(patches, axis=1)

    # --- one fused MXU matmul for the whole block -----------------------------
    lhs = w_ref[...]
    if mxu_bf16:                                # opt-in v6e/v7x bf16 MXU path
        lhs = lhs.astype(jnp.bfloat16)
        patch = patch.astype(jnp.bfloat16)
    acc = jnp.dot(lhs, patch, preferred_element_type=jnp.float32)    # (Cout, B_blk*MW)
    acc = acc + b_ref[...]                      # bias once, after the dot

    # --- drop garbage columns, store a lane-dense (Cout, Hout*Wout) slab ------
    for b in range(B_blk):
        acc_b = acc[:, b * MW:(b + 1) * MW]
        rows = [acc_b[:, ho * Wp: ho * Wp + Wout] for ho in range(Hout)]
        o_ref[b] = jnp.concatenate(rows, axis=1).astype(o_ref.dtype)


def equalized_conv2d(x_nchw, weight, bias, padding=0, *, mxu_bf16=False):
    """x_nchw: (N, Cin, H, W); weight: (Cout, Cin, KH, KW); bias: (Cout,) or None."""
    N, Cin, H, W = map(int, x_nchw.shape)
    Cout, _, KH, KW = map(int, weight.shape)
    # Faithful to the module: c = sqrt(2.0 / in_dim * kernel_size**2).
    c = float(np.sqrt(2.0 / Cin * KH ** 2))

    Hout = H + 2 * padding - KH + 1
    Wout = W + 2 * padding - KW + 1
    Hp, Wp = H + 2 * padding, W + 2 * padding
    K = KH * KW * Cin
    M = Hout * Wout
    MW = Hout * Wp
    FLAT = Hp * Wp + (KW - 1)            # +tail so every tap window stays in-bounds
    dtype = x_nchw.dtype
    isz = dtype.itemsize

    # Lane-dense input view: metadata-only reshape of contiguous NCHW.
    x_flat = x_nchw.reshape(N, Cin, H * W)

    # Weight -> (Cout, K), K ordered (kh, kw, ci) to match the in-kernel tap
    # concatenation; equalized-LR scale folded in once (grid-invariant, tiny).
    w2 = (jnp.transpose(weight, (0, 2, 3, 1)).reshape(Cout, K) * c).astype(dtype)
    b_vec = bias if bias is not None else jnp.zeros((Cout,), dtype)
    b2 = jnp.asarray(b_vec, dtype=dtype).reshape(Cout, 1)

    # Images per grid step: as many as fit a conservative VMEM budget (v7x has
    # 64 MiB physical / 32 MiB scoped default), keeping >= 2 grid steps so the
    # 'parallel' axis still feeds both TensorCores on megacore parts.
    def step_vmem_bytes(bb):
        x_in = bb * Cin * H * W * isz            # input block  (double-buffered)
        out = bb * Cout * M * isz                # output block (double-buffered)
        wts = (Cout * K + Cout) * isz            # weight + bias (double-buffered)
        pad_sc = bb * Cin * FLAT * isz           # padded-image scratch (single)
        live = bb * (K * MW + Cout * MW) * 4     # patch + f32 accumulator values
        return 2 * (x_in + out + wts) + pad_sc + live

    VMEM_BUDGET = 24 * 1024 * 1024
    B_blk = 1
    for cand in range(min(max(N // 2, 1), 8), 0, -1):    # cap unroll at 8 imgs/step
        if N % cand == 0 and step_vmem_bytes(cand) <= VMEM_BUDGET:
            B_blk = cand
            break
    vmem_limit = int(min(64 * 1024 * 1024,               # v7x-safe ceiling
                         max(32 * 1024 * 1024, 2 * step_vmem_bytes(B_blk))))

    kernel = functools.partial(
        _eq_conv_kernel, KH=KH, KW=KW, H=H, W=W, Hout=Hout, Wout=Wout,
        Wp=Wp, Cin=Cin, pad=padding, B_blk=B_blk, mxu_bf16=mxu_bf16)

    out = pl.pallas_call(
        kernel,
        out_shape=jax.ShapeDtypeStruct((N, Cout, M), dtype),
        grid_spec=pltpu.PrefetchScalarGridSpec(
            num_scalar_prefetch=0,
            grid=(N // B_blk,),
            in_specs=[
                pl.BlockSpec((B_blk, Cin, H * W), lambda n: (n, 0, 0)),
                pl.BlockSpec((Cout, K), lambda n: (0, 0)),   # grid-invariant
                pl.BlockSpec((Cout, 1), lambda n: (0, 0)),   # grid-invariant
            ],
            out_specs=pl.BlockSpec((B_blk, Cout, M), lambda n: (n, 0, 0)),
            scratch_shapes=[pltpu.VMEM((B_blk, Cin, FLAT), dtype)],
        ),
        compiler_params=pltpu.CompilerParams(
            dimension_semantics=("parallel",),
            vmem_limit_bytes=vmem_limit,
        ),
    )(x_flat, w2, b2)

    # Metadata-only reshape back to NCHW (no transpose, no channel un-pad).
    return out.reshape(N, Cout, Hout, Wout)


if __name__ == "__main__":
    # Module config: EqualizedConv2d(in_dim=4, out_dim=8, kernel_size=3, padding=1)
    in_dim, out_dim, ksize, padding = 4, 8, 3, 1
    N, H, W = 2, 16, 16

    key = jax.random.PRNGKey(0)
    kx, kw = jax.random.split(key)
    x = jax.random.normal(kx, (N, in_dim, H, W), dtype=jnp.float32)
    weight = jax.random.normal(kw, (out_dim, in_dim, ksize, ksize), dtype=jnp.float32)
    bias = jnp.zeros((out_dim,), dtype=jnp.float32)   # module inits bias to 0

    y = equalized_conv2d(x, weight, bias, padding=padding)
    y = jax.block_until_ready(y)

    # Reference check against XLA's conv with the same equalized-lr scaling.
    c = float(np.sqrt(2.0 / in_dim * ksize ** 2))
    y_ref = jax.lax.conv_general_dilated(
        x, weight * c, window_strides=(1, 1), padding=[(padding, padding)] * 2,
        dimension_numbers=("NCHW", "OIHW", "NCHW")) + bias.reshape(1, -1, 1, 1)
    np.testing.assert_allclose(np.asarray(y), np.asarray(y_ref), rtol=1e-4, atol=1e-4)

    print("KERNEL_OK")
</pallas_src>

<mosaic_0001>
module attributes {stable_mosaic.version = 11 : i64} {
  func.func @_eq_conv_kernel(%arg0: i32, %arg1: memref<1x4x256xf32, #tpu.memory_space<vmem>>, %arg2: memref<8x36xf32, #tpu.memory_space<vmem>>, %arg3: memref<8x1xf32, #tpu.memory_space<vmem>>, %arg4: memref<1x8x256xf32, #tpu.memory_space<vmem>>, %arg5: memref<1x4x326xf32, #tpu.memory_space<vmem>>) attributes {dimension_semantics = [#tpu.dimension_semantics<parallel>], iteration_bounds = array<i64: 2>, scalar_prefetch = 0 : i64, scratch_operands = 1 : i64, tpu.core_type = #tpu.core_type<tc>, window_params = [{transform_indices = @transform_0, window_bounds = array<i64: 1, 4, 256>}, {pipeline_mode = #tpu.pipeline_mode<synchronous>, transform_indices = @transform_1, window_bounds = array<i64: 8, 36>}, {pipeline_mode = #tpu.pipeline_mode<synchronous>, transform_indices = @transform_2, window_bounds = array<i64: 8, 1>}, {transform_indices = @transform_3, window_bounds = array<i64: 1, 8, 256>}]} {
    %cst = arith.constant 0.000000e+00 : f32
    %0 = vector.broadcast %cst : f32 to vector<1x4x326xf32>
    %c0 = arith.constant 0 : index
    %c0_0 = arith.constant 0 : index
    %c0_1 = arith.constant 0 : index
    %1 = vector.load %arg5[%c0, %c0_0, %c0_1] : memref<1x4x326xf32, #tpu.memory_space<vmem>>, vector<1x4x326xf32>
    tpu.vector_store %arg5[%c0, %c0_0, %c0_1], %0 {strides = array<i32>} : memref<1x4x326xf32, #tpu.memory_space<vmem>>, vector<1x4x326xf32>,
    %c0_2 = arith.constant 0 : index
    %c0_3 = arith.constant 0 : index
    %c0_4 = arith.constant 0 : index
    %2 = vector.load %arg1[%c0_2, %c0_3, %c0_4] : memref<1x4x256xf32, #tpu.memory_space<vmem>>, vector<1x4x16xf32>
    %c0_5 = arith.constant 0 : index
    %c0_6 = arith.constant 0 : index
    %c19 = arith.constant 19 : index
    %3 = vector.load %arg5[%c0_5, %c0_6, %c19] : memref<1x4x326xf32, #tpu.memory_space<vmem>>, vector<1x4x16xf32>
    tpu.vector_store %arg5[%c0_5, %c0_6, %c19], %2 {strides = array<i32>} : memref<1x4x326xf32, #tpu.memory_space<vmem>>, vector<1x4x16xf32>,
    %c0_7 = arith.constant 0 : index
    %c0_8 = arith.constant 0 : index
    %c16 = arith.constant 16 : index
    %4 = vector.load %arg1[%c0_7, %c0_8, %c16] : memref<1x4x256xf32, #tpu.memory_space<vmem>>, vector<1x4x16xf32>
    %c0_9 = arith.constant 0 : index
    %c0_10 = arith.constant 0 : index
    %c37 = arith.constant 37 : index
    %5 = vector.load %arg5[%c0_9, %c0_10, %c37] : memref<1x4x326xf32, #tpu.memory_space<vmem>>, vector<1x4x16xf32>
    tpu.vector_store %arg5[%c0_9, %c0_10, %c37], %4 {strides = array<i32>} : memref<1x4x326xf32, #tpu.memory_space<vmem>>, vector<1x4x16xf32>,
    %c0_11 = arith.constant 0 : index
    %c0_12 = arith.constant 0 : index
    %c32 = arith.constant 32 : index
    %6 = vector.load %arg1[%c0_11, %c0_12, %c32] : memref<1x4x256xf32, #tpu.memory_space<vmem>>, vector<1x4x16xf32>
    %c0_13 = arith.constant 0 : index
    %c0_14 = arith.constant 0 : index
    %c55 = arith.constant 55 : index
    %7 = vector.load %arg5[%c0_13, %c0_14, %c55] : memref<1x4x326xf32, #tpu.memory_space<vmem>>, vector<1x4x16xf32>
    tpu.vector_store %arg5[%c0_13, %c0_14, %c55], %6 {strides = array<i32>} : memref<1x4x326xf32, #tpu.memory_space<vmem>>, vector<1x4x16xf32>,
    %c0_15 = arith.constant 0 : index
    %c0_16 = arith.constant 0 : index
    %c48 = arith.constant 48 : index
    %8 = vector.load %arg1[%c0_15, %c0_16, %c48] : memref<1x4x256xf32, #tpu.memory_space<vmem>>, vector<1x4x16xf32>
    %c0_17 = arith.constant 0 : index
    %c0_18 = arith.constant 0 : index
    %c73 = arith.constant 73 : index
    %9 = vector.load %arg5[%c0_17, %c0_18, %c73] : memref<1x4x326xf32, #tpu.memory_space<vmem>>, vector<1x4x16xf32>
    tpu.vector_store %arg5[%c0_17, %c0_18, %c73], %8 {strides = array<i32>} : memref<1x4x326xf32, #tpu.memory_space<vmem>>, vector<1x4x16xf32>,
    %c0_19 = arith.constant 0 : index
    %c0_20 = arith.constant 0 : index
    %c64 = arith.constant 64 : index
    %10 = vector.load %arg1[%c0_19, %c0_20, %c64] : memref<1x4x256xf32, #tpu.memory_space<vmem>>, vector<1x4x16xf32>
    %c0_21 = arith.constant 0 : index
    %c0_22 = arith.constant 0 : index
    %c91 = arith.constant 91 : index
    %11 = vector.load %arg5[%c0_21, %c0_22, %c91] : memref<1x4x326xf32, #tpu.memory_space<vmem>>, vector<1x4x16xf32>
    tpu.vector_store %arg5[%c0_21, %c0_22, %c91], %10 {strides = array<i32>} : memref<1x4x326xf32, #tpu.memory_space<vmem>>, vector<1x4x16xf32>,
    %c0_23 = arith.constant 0 : index
    %c0_24 = arith.constant 0 : index
    %c80 = arith.constant 80 : index
    %12 = vector.load %arg1[%c0_23, %c0_24, %c80] : memref<1x4x256xf32, #tpu.memory_space<vmem>>, vector<1x4x16xf32>
    %c0_25 = arith.constant 0 : index
    %c0_26 = arith.constant 0 : index
    %c109 = arith.constant 109 : index
    %13 = vector.load %arg5[%c0_25, %c0_26, %c109] : memref<1x4x326xf32, #tpu.memory_space<vmem>>, vector<1x4x16xf32>
    tpu.vector_store %arg5[%c0_25, %c0_26, %c109], %12 {strides = array<i32>} : memref<1x4x326xf32, #tpu.memory_space<vmem>>, vector<1x4x16xf32>,
    %c0_27 = arith.constant 0 : index
    %c0_28 = arith.constant 0 : index
    %c96 = arith.constant 96 : index
    %14 = vector.load %arg1[%c0_27, %c0_28, %c96] : memref<1x4x256xf32, #tpu.memory_space<vmem>>, vector<1x4x16xf32>
    %c0_29 = arith.constant 0 : index
    %c0_30 = arith.constant 0 : index
    %c127 = arith.constant 127 : index
    %15 = vector.load %arg5[%c0_29, %c0_30, %c127] : memref<1x4x326xf32, #tpu.memory_space<vmem>>, vector<1x4x16xf32>
    tpu.vector_store %arg5[%c0_29, %c0_30, %c127], %14 {strides = array<i32>} : memref<1x4x326xf32, #tpu.memory_space<vmem>>, vector<1x4x16xf32>,
    %c0_31 = arith.constant 0 : index
    %c0_32 = arith.constant 0 : index
    %c112 = arith.constant 112 : index
    %16 = vector.load %arg1[%c0_31, %c0_32, %c112] : memref<1x4x256xf32, #tpu.memory_space<vmem>>, vector<1x4x16xf32>
    %c0_33 = arith.constant 0 : index
    %c0_34 = arith.constant 0 : index
    %c145 = arith.constant 145 : index
    %17 = vector.load %arg5[%c0_33, %c0_34, %c145] : memref<1x4x326xf32, #tpu.memory_space<vmem>>, vector<1x4x16xf32>
    tpu.vector_store %arg5[%c0_33, %c0_34, %c145], %16 {strides = array<i32>} : memref<1x4x326xf32, #tpu.memory_space<vmem>>, vector<1x4x16xf32>,
    %c0_35 = arith.constant 0 : index
    %c0_36 = arith.constant 0 : index
    %c128 = arith.constant 128 : index
    %18 = vector.load %arg1[%c0_35, %c0_36, %c128] : memref<1x4x256xf32, #tpu.memory_space<vmem>>, vector<1x4x16xf32>
    %c0_37 = arith.constant 0 : index
    %c0_38 = arith.constant 0 : index
    %c163 = arith.constant 163 : index
    %19 = vector.load %arg5[%c0_37, %c0_38, %c163] : memref<1x4x326xf32, #tpu.memory_space<vmem>>, vector<1x4x16xf32>
    tpu.vector_store %arg5[%c0_37, %c0_38, %c163], %18 {strides = array<i32>} : memref<1x4x326xf32, #tpu.memory_space<vmem>>, vector<1x4x16xf32>,
    %c0_39 = arith.constant 0 : index
    %c0_40 = arith.constant 0 : index
    %c144 = arith.constant 144 : index
    %20 = vector.load %arg1[%c0_39, %c0_40, %c144] : memref<1x4x256xf32, #tpu.memory_space<vmem>>, vector<1x4x16xf32>
    %c0_41 = arith.constant 0 : index
    %c0_42 = arith.constant 0 : index
    %c181 = arith.constant 181 : index
    %21 = vector.load %arg5[%c0_41, %c0_42, %c181] : memref<1x4x326xf32, #tpu.memory_space<vmem>>, vector<1x4x16xf32>
    tpu.vector_store %arg5[%c0_41, %c0_42, %c181], %20 {strides = array<i32>} : memref<1x4x326xf32, #tpu.memory_space<vmem>>, vector<1x4x16xf32>,
    %c0_43 = arith.constant 0 : index
    %c0_44 = arith.constant 0 : index
    %c160 = arith.constant 160 : index
    %22 = vector.load %arg1[%c0_43, %c0_44, %c160] : memref<1x4x256xf32, #tpu.memory_space<vmem>>, vector<1x4x16xf32>
    %c0_45 = arith.constant 0 : index
    %c0_46 = arith.constant 0 : index
    %c199 = arith.constant 199 : index
    %23 = vector.load %arg5[%c0_45, %c0_46, %c199] : memref<1x4x326xf32, #tpu.memory_space<vmem>>, vector<1x4x16xf32>
    tpu.vector_store %arg5[%c0_45, %c0_46, %c199], %22 {strides = array<i32>} : memref<1x4x326xf32, #tpu.memory_space<vmem>>, vector<1x4x16xf32>,
    %c0_47 = arith.constant 0 : index
    %c0_48 = arith.constant 0 : index
    %c176 = arith.constant 176 : index
    %24 = vector.load %arg1[%c0_47, %c0_48, %c176] : memref<1x4x256xf32, #tpu.memory_space<vmem>>, vector<1x4x16xf32>
    %c0_49 = arith.constant 0 : index
    %c0_50 = arith.constant 0 : index
    %c217 = arith.constant 217 : index
    %25 = vector.load %arg5[%c0_49, %c0_50, %c217] : memref<1x4x326xf32, #tpu.memory_space<vmem>>, vector<1x4x16xf32>
    tpu.vector_store %arg5[%c0_49, %c0_50, %c217], %24 {strides = array<i32>} : memref<1x4x326xf32, #tpu.memory_space<vmem>>, vector<1x4x16xf32>,
    %c0_51 = arith.constant 0 : index
    %c0_52 = arith.constant 0 : index
    %c192 = arith.constant 192 : index
    %26 = vector.load %arg1[%c0_51, %c0_52, %c192] : memref<1x4x256xf32, #tpu.memory_space<vmem>>, vector<1x4x16xf32>
    %c0_53 = arith.constant 0 : index
    %c0_54 = arith.constant 0 : index
    %c235 = arith.constant 235 : index
    %27 = vector.load %arg5[%c0_53, %c0_54, %c235] : memref<1x4x326xf32, #tpu.memory_space<vmem>>, vector<1x4x16xf32>
    tpu.vector_store %arg5[%c0_53, %c0_54, %c235], %26 {strides = array<i32>} : memref<1x4x326xf32, #tpu.memory_space<vmem>>, vector<1x4x16xf32>,
    %c0_55 = arith.constant 0 : index
    %c0_56 = arith.constant 0 : index
    %c208 = arith.constant 208 : index
    %28 = vector.load %arg1[%c0_55, %c0_56, %c208] : memref<1x4x256xf32, #tpu.memory_space<vmem>>, vector<1x4x16xf32>
    %c0_57 = arith.constant 0 : index
    %c0_58 = arith.constant 0 : index
    %c253 = arith.constant 253 : index
    %29 = vector.load %arg5[%c0_57, %c0_58, %c253] : memref<1x4x326xf32, #tpu.memory_space<vmem>>, vector<1x4x16xf32>
    tpu.vector_store %arg5[%c0_57, %c0_58, %c253], %28 {strides = array<i32>} : memref<1x4x326xf32, #tpu.memory_space<vmem>>, vector<1x4x16xf32>,
    %c0_59 = arith.constant 0 : index
    %c0_60 = arith.constant 0 : index
    %c224 = arith.constant 224 : index
    %30 = vector.load %arg1[%c0_59, %c0_60, %c224] : memref<1x4x256xf32, #tpu.memory_space<vmem>>, vector<1x4x16xf32>
    %c0_61 = arith.constant 0 : index
    %c0_62 = arith.constant 0 : index
    %c271 = arith.constant 271 : index
    %31 = vector.load %arg5[%c0_61, %c0_62, %c271] : memref<1x4x326xf32, #tpu.memory_space<vmem>>, vector<1x4x16xf32>
    tpu.vector_store %arg5[%c0_61, %c0_62, %c271], %30 {strides = array<i32>} : memref<1x4x326xf32, #tpu.memory_space<vmem>>, vector<1x4x16xf32>,
    %c0_63 = arith.constant 0 : index
    %c0_64 = arith.constant 0 : index
    %c240 = arith.constant 240 : index
    %32 = vector.load %arg1[%c0_63, %c0_64, %c240] : memref<1x4x256xf32, #tpu.memory_space<vmem>>, vector<1x4x16xf32>
    %c0_65 = arith.constant 0 : index
    %c0_66 = arith.constant 0 : index
    %c289 = arith.constant 289 : index
    %33 = vector.load %arg5[%c0_65, %c0_66, %c289] : memref<1x4x326xf32, #tpu.memory_space<vmem>>, vector<1x4x16xf32>
    tpu.vector_store %arg5[%c0_65, %c0_66, %c289], %32 {strides = array<i32>} : memref<1x4x326xf32, #tpu.memory_space<vmem>>, vector<1x4x16xf32>,
    %c0_67 = arith.constant 0 : index
    %c0_68 = arith.constant 0 : index
    %c0_69 = arith.constant 0 : index
    %34 = vector.load %arg5[%c0_67, %c0_68, %c0_69] : memref<1x4x326xf32, #tpu.memory_space<vmem>>, vector<1x4x288xf32>
    %35 = vector.shape_cast %34 : vector<1x4x288xf32> to vector<4x288xf32>
    %c0_70 = arith.constant 0 : index
    %c0_71 = arith.constant 0 : index
    %c1 = arith.constant 1 : index
    %36 = vector.load %arg5[%c0_70, %c0_71, %c1] : memref<1x4x326xf32, #tpu.memory_space<vmem>>, vector<1x4x288xf32>
    %37 = vector.shape_cast %36 : vector<1x4x288xf32> to vector<4x288xf32>
    %c0_72 = arith.constant 0 : index
    %c0_73 = arith.constant 0 : index
    %c2 = arith.constant 2 : index
    %38 = vector.load %arg5[%c0_72, %c0_73, %c2] : memref<1x4x326xf32, #tpu.memory_space<vmem>>, vector<1x4x288xf32>
    %39 = vector.shape_cast %38 : vector<1x4x288xf32> to vector<4x288xf32>
    %c0_74 = arith.constant 0 : index
    %c0_75 = arith.constant 0 : index
    %c18 = arith.constant 18 : index
    %40 = vector.load %arg5[%c0_74, %c0_75, %c18] : memref<1x4x326xf32, #tpu.memory_space<vmem>>, vector<1x4x288xf32>
    %41 = vector.shape_cast %40 : vector<1x4x288xf32> to vector<4x288xf32>
    %c0_76 = arith.constant 0 : index
    %c0_77 = arith.constant 0 : index
    %c19_78 = arith.constant 19 : index
    %42 = vector.load %arg5[%c0_76, %c0_77, %c19_78] : memref<1x4x326xf32, #tpu.memory_space<vmem>>, vector<1x4x288xf32>
    %43 = vector.shape_cast %42 : vector<1x4x288xf32> to vector<4x288xf32>
    %c0_79 = arith.constant 0 : index
    %c0_80 = arith.constant 0 : index
    %c20 = arith.constant 20 : index
    %44 = vector.load %arg5[%c0_79, %c0_80, %c20] : memref<1x4x326xf32, #tpu.memory_space<vmem>>, vector<1x4x288xf32>
    %45 = vector.shape_cast %44 : vector<1x4x288xf32> to vector<4x288xf32>
    %c0_81 = arith.constant 0 : index
    %c0_82 = arith.constant 0 : index
    %c36 = arith.constant 36 : index
    %46 = vector.load %arg5[%c0_81, %c0_82, %c36] : memref<1x4x326xf32, #tpu.memory_space<vmem>>, vector<1x4x288xf32>
    %47 = vector.shape_cast %46 : vector<1x4x288xf32> to vector<4x288xf32>
    %c0_83 = arith.constant 0 : index
    %c0_84 = arith.constant 0 : index
    %c37_85 = arith.constant 37 : index
    %48 = vector.load %arg5[%c0_83, %c0_84, %c37_85] : memref<1x4x326xf32, #tpu.memory_space<vmem>>, vector<1x4x288xf32>
    %49 = vector.shape_cast %48 : vector<1x4x288xf32> to vector<4x288xf32>
    %c0_86 = arith.constant 0 : index
    %c0_87 = arith.constant 0 : index
    %c38 = arith.constant 38 : index
    %50 = vector.load %arg5[%c0_86, %c0_87, %c38] : memref<1x4x326xf32, #tpu.memory_space<vmem>>, vector<1x4x288xf32>
    %51 = vector.shape_cast %50 : vector<1x4x288xf32> to vector<4x288xf32>
    %52 = tpu.concatenate %35, %37, %39, %41, %43, %45, %47, %49, %51 in 0 : vector<4x288xf32>, vector<4x288xf32>, vector<4x288xf32>, vector<4x288xf32>, vector<4x288xf32>, vector<4x288xf32>, vector<4x288xf32>, vector<4x288xf32>, vector<4x288xf32> -> vector<36x288xf32>
    %c0_88 = arith.constant 0 : index
    %c0_89 = arith.constant 0 : index
    %53 = vector.load %arg2[%c0_88, %c0_89] : memref<8x36xf32, #tpu.memory_space<vmem>>, vector<8x36xf32>
    %cst_90 = arith.constant dense<0.000000e+00> : vector<8x288xf32>
    %54 = tpu.matmul %53, %52, %cst_90 {dimension_numbers = #tpu.dot_dimension_numbers<[1], [0], [0], [1], [0, 0, 1, 1], [], []>} : vector<8x36xf32>, vector<36x288xf32>, vector<8x288xf32> -> vector<8x288xf32>
    %c0_91 = arith.constant 0 : index
    %c0_92 = arith.constant 0 : index
    %55 = vector.load %arg3[%c0_91, %c0_92] : memref<8x1xf32, #tpu.memory_space<vmem>>, vector<8x1xf32>
    %56 = vector.broadcast %55 : vector<8x1xf32> to vector<8x288xf32>
    %57 = arith.addf %54, %56 : vector<8x288xf32>
    %58 = vector.extract_strided_slice %57 {offsets = [0, 0], sizes = [8, 16], strides = [1, 1]} : vector<8x288xf32> to vector<8x16xf32>
    %59 = vector.extract_strided_slice %57 {offsets = [0, 18], sizes = [8, 16], strides = [1, 1]} : vector<8x288xf32> to vector<8x16xf32>
    %60 = vector.extract_strided_slice %57 {offsets = [0, 36], sizes = [8, 16], strides = [1, 1]} : vector<8x288xf32> to vector<8x16xf32>
    %61 = vector.extract_strided_slice %57 {offsets = [0, 54], sizes = [8, 16], strides = [1, 1]} : vector<8x288xf32> to vector<8x16xf32>
    %62 = vector.extract_strided_slice %57 {offsets = [0, 72], sizes = [8, 16], strides = [1, 1]} : vector<8x288xf32> to vector<8x16xf32>
    %63 = vector.extract_strided_slice %57 {offsets = [0, 90], sizes = [8, 16], strides = [1, 1]} : vector<8x288xf32> to vector<8x16xf32>
    %64 = vector.extract_strided_slice %57 {offsets = [0, 108], sizes = [8, 16], strides = [1, 1]} : vector<8x288xf32> to vector<8x16xf32>
    %65 = vector.extract_strided_slice %57 {offsets = [0, 126], sizes = [8, 16], strides = [1, 1]} : vector<8x288xf32> to vector<8x16xf32>
    %66 = vector.extract_strided_slice %57 {offsets = [0, 144], sizes = [8, 16], strides = [1, 1]} : vector<8x288xf32> to vector<8x16xf32>
    %67 = vector.extract_strided_slice %57 {offsets = [0, 162], sizes = [8, 16], strides = [1, 1]} : vector<8x288xf32> to vector<8x16xf32>
    %68 = vector.extract_strided_slice %57 {offsets = [0, 180], sizes = [8, 16], strides = [1, 1]} : vector<8x288xf32> to vector<8x16xf32>
    %69 = vector.extract_strided_slice %57 {offsets = [0, 198], sizes = [8, 16], strides = [1, 1]} : vector<8x288xf32> to vector<8x16xf32>
    %70 = vector.extract_strided_slice %57 {offsets = [0, 216], sizes = [8, 16], strides = [1, 1]} : vector<8x288xf32> to vector<8x16xf32>
    %71 = vector.extract_strided_slice %57 {offsets = [0, 234], sizes = [8, 16], strides = [1, 1]} : vector<8x288xf32> to vector<8x16xf32>
    %72 = vector.extract_strided_slice %57 {offsets = [0, 252], sizes = [8, 16], strides = [1, 1]} : vector<8x288xf32> to vector<8x16xf32>
    %73 = vector.extract_strided_slice %57 {offsets = [0, 270], sizes = [8, 16], strides = [1, 1]} : vector<8x288xf32> to vector<8x16xf32>
    %74 = tpu.concatenate %58, %59, %60, %61, %62, %63, %64, %65, %66, %67, %68, %69, %70, %71, %72, %73 in 1 : vector<8x16xf32>, vector<8x16xf32>, vector<8x16xf32>, vector<8x16xf32>, vector<8x16xf32>, vector<8x16xf32>, vector<8x16xf32>, vector<8x16xf32>, vector<8x16xf32>, vector<8x16xf32>, vector<8x16xf32>, vector<8x16xf32>, vector<8x16xf32>, vector<8x16xf32>, vector<8x16xf32>, vector<8x16xf32> -> vector<8x256xf32>
    %c0_93 = arith.constant 0 : index
    %c0_94 = arith.constant 0 : index
    %c0_95 = arith.constant 0 : index
    %75 = vector.load %arg4[%c0_93, %c0_94, %c0_95] : memref<1x8x256xf32, #tpu.memory_space<vmem>>, vector<1x8x256xf32>
    %76 = vector.shape_cast %75 : vector<1x8x256xf32> to vector<8x256xf32>
    %77 = vector.shape_cast %74 : vector<8x256xf32> to vector<1x8x256xf32>
    tpu.vector_store %arg4[%c0_93, %c0_94, %c0_95], %77 {strides = array<i32>} : memref<1x8x256xf32, #tpu.memory_space<vmem>>, vector<1x8x256xf32>,
    return
  }
  func.func @transform_0(%arg0: i32) -> (i32, i32, i32) {
    %c0_i32 = arith.constant 0 : i32
    %c0_i32_0 = arith.constant 0 : i32
    %c0_i32_1 = arith.constant 0 : i32
    return %arg0, %c0_i32, %c0_i32_0 : i32, i32, i32
  }
  func.func @transform_1(%arg0: i32) -> (i32, i32) {
    %c0_i32 = arith.constant 0 : i32
    %c0_i32_0 = arith.constant 0 : i32
    %c0_i32_1 = arith.constant 0 : i32
    return %c0_i32, %c0_i32_0 : i32, i32
  }
  func.func @transform_2(%arg0: i32) -> (i32, i32) {
    %c0_i32 = arith.constant 0 : i32
    %c0_i32_0 = arith.constant 0 : i32
    %c0_i32_1 = arith.constant 0 : i32
    return %c0_i32, %c0_i32_0 : i32, i32
  }
  func.func @transform_3(%arg0: i32) -> (i32, i32, i32) {
    %c0_i32 = arith.constant 0 : i32
    %c0_i32_0 = arith.constant 0 : i32
    %c0_i32_1 = arith.constant 0 : i32
    return %arg0, %c0_i32, %c0_i32_0 : i32, i32, i32
  }
}

</mosaic_0001>

<bundles_post_ra>
// kernel: tpu_custom_call.1
= control target key start
LH: loop header
LB: loop body
LE: loop exit
PB: predicated region body
PF: predicated region fallthrough
CT: control target
= control target key end

     0   :  { %8 = vsyncpa [#allocation4], 0  ;;  %s1268_s0 = inlined_call_operand.hbm [shape: f32[2,4,256], index: 0, kind: input, shape index: {}]   ;;  %s1269_s1 = inlined_call_operand.vmem [shape: f32[8,36], index: 1, kind: input, shape index: {}]   ;;  %s1270_s2 = inlined_call_operand.vmem [shape: f32[8,1], index: 2, kind: input, shape index: {}]   ;;  %s1271_s3 = inlined_call_operand.hbm [shape: f32[2,8,256], index: 3, kind: output, shape index: {}]  }
   0x1   :  { %10 = vsyncpa [#allocation4 + $0x1], 0 }
   0x2   :  { %11 = vsyncpa [#allocation5], 0 }
   0x3   :  { %13 = vsyncpa [#allocation5 + $0x1], 0  ;;  %s1026_s12 = smov 0   ;;  %s1028_s13 = smov 0  }
   0x4   :  { %s1030_s14 = smov 0   ;;  %s1032_s15 = smov 0  }
   0x5 LB: > { %s1047_s16 = sadd.s32 4294967295, %s966_s15   ;;  %s728_s17 = sadd.s32 4294967294, %s966_s15   ;;  %s966_s15 = sphi %s1032_s15, %s1281_s15   ;;  %s962_s14 = sphi %s1030_s14, %s1280_s14   ;;  %s958_s13 = sphi %s1028_s13, %s1279_s13   ;;  %s954_s12 = sphi %s1026_s12, %s1278_s12  }
   0x6   : > { %s1051_s18 = sadd.s32 1, %s966_s15   ;;  %s26_s19 = sadd.s32 1, %s962_s14 }
   0x7   : > { %s23_s20 = ssub.s32 %s966_s15, %s1051_s18  ;;  %p33_p0 = scmp.ne.s32.totalorder %s962_s14, %s958_s13 }
   0x8   : > { %p24_p1 = scmp.eq.s32.totalorder %s23_s20, 0  ;;  %p34_p2 = scmp.eq.s32.totalorder %s966_s15, 0 }
   0x9   : > { %p39_p3 = scmp.ne.s32.totalorder %s958_s13, %s954_s12  ;;  %p40_p4 = scmp.eq.s32.totalorder %s1047_s16, 0 }
   0xa   : > { %s1063_s21 = scalar_select %p24_p1, %s962_s14, %s26_s19  }
   0xb   : > { %p1065_p5 = por %p34_p2, %p33_p0  ;;  %p1069_p6 = por %p40_p4, %p39_p3 }
   0xc   : > { %p105_p7 = scmp.eq.s32.totalorder %s1047_s16, 1  ;;  %p111_p8 = scmp.eq.s32.totalorder %s728_s17, 1 }
   0xd   : > { %p762_p10 = scmp.lt.s32.totalorder %s966_s15, 2  ;;  %s137_s26 = sand.u32 1, %s962_s14  }
   0xe   : > { %p1076_p11 = por %p105_p7, %p33_p0  ;;  %p1080_p12 = por %p111_p8, %p39_p3 }
   0xf   : > { %s748_s27 = sshll.u32 %s966_s15, 3  ;;  %s731_s28 = sshll.u32 %s137_s26, 3 }
  0x10   : > { %s146_s4 = scalar_lea.hbm %s1268_s0, %s748_s27  ;;  %s141_s6 = scalar_lea.vmem [#allocation3], %s731_s28 }
  0x11   : > { %s148_s5 = sshll.u32 %s146_s4, 4  ;;  %s150_s7 = sshll.u32 %s141_s6, 4  ;;  %s149_s5 = int_to_ptr.hbm [resolvable:$true] %s148_s5  ;;  %s151_s7 = int_to_ptr.vmem [resolvable:$true] %s150_s7 }
  0x12   : > { %p1091_p13 = pnand %p762_p10, %p1065_p5  ;;  %p734_p0 = scmp.ge.s32.totalorder %s966_s15, 1 }
  0x13   : > { %p155_p1 = scmp.lt.s32.totalorder %s966_s15, 3  ;;  %s138_s9 = scalar_lea.sflag [#allocation4], %s137_s26 }
  0x14   : > { %s870_s10 = sshra.s32 %s149_s5, 4  ;;  %p874_p3 = pneg %p1091_p13  ;;  %s871_s10 = int_to_ptr.hbm [resolvable:$true] %s870_s10 }
  0x15   : > { %s872_s11 = scalar_lea.hbm %s871_s10, 8  ;;  %s877_s20 = scalar_lea.hbm %s1268_s0, 16 }
  0x16   : > { %p873_p2 = scmp.ne.s32.totalorder %s871_s10, %s872_s11  ;;  %p878_p5 = scmp.lt.s32.totalorder %s871_s10, %s1268_s0 }
  0x17   : > { %p879_p8 = scmp.lt.s32.totalorder %s877_s20, %s872_s11 }
  0x18   : > { %p875_p4 = pnand %p874_p3, %p873_p2 }
  0x19   : > { %p880_p10 = por %p879_p8, %p878_p5 }
  0x1a   : > { %p876_p7 = pneg %p875_p4 }
  0x1c   : > { %p881_p9 = pnand %p880_p10, %p876_p7 }
  0x1e   : > { %884 = shalt.err (!%p881_p9)
}
  0x1f   : > { %757 = dma.hbm_to_vmem [thread:$0]  (!%p1091_p13), %s149_s5, 128, %s151_s7, %s138_s9  }
  0x20   : > { %p156_p2 = pnand %p734_p0, %p155_p1 }
  0x21   : > { %s1112_s26 = sand.u32 (!%p156_p2), 1, %s958_s13  }
  0x22   : > { %159 = sbr.rel (%p156_p2) target bundleno = 695 (0x2b7), region = 32  ;;  %s735_s28 = sshll.u32 (!%p156_p2), %s1112_s26, 3 }
  0x23   : > { %s162_s29 = scalar_lea.sflag (!%p156_p2), [#allocation4], %s1112_s26  ;;  %s1116_s30 = scalar_lea.vmem (!%p156_p2), [#allocation3], %s735_s28 }
  0x27   : > { %945 = dma.done.wait (%p1069_p6), %s162_s29, 128  }
  0x28   : > { %947 = vsyncadd (%p1069_p6), %s162_s29, 4294967168  ;;  %v192_v0 = vld [vmem:[%s1116_s30] sm:$0xf]  ;;  %s968_s4 = smov 19   ;;  %s969_s5 = smov 23   ;;  %vm190_vm0 = vcmask 568320  }
  0x29   : > { %v206_v1 = vld [vmem:[%s1116_s30] sm:$0xf]  ;;  %194 = vrot.lane.b32.xlu0 %v192_v0, %s968_s4  ;;  %s970_s6 = smov 31   ;;  %s971_s23 = smov 21   ;;  %v973_v6 = vmov 0.0   ;;  %vm197_vm1 = vcmask 281752  }
  0x2a   : > { %208 = vrot.lane.b32.xlu1 %v206_v1, %s969_s5  ;;  %v234_v2 = vld [vmem:[%s1116_s30] sm:$0xf]  ;;  %s972_s7 = smov 25   ;;  %189 = vst [vmem:[#allocation2] sm:$0xff] %v973_v6  ;;  %s974_s8 = smov 27   ;;  %vm204_vm2 = vcmask 429352  }
  0x2b   : > { %236 = vrot.lane.b32.xlu2 %v234_v2, %s970_s6  ;;  %v199_v3 = vld [vmem:[%s1116_s30] sm:$0xf]  ;;  %191 = vst.msk [vmem:[#allocation2 + $0x8] sm:$0xf] %vm190_vm0, %v973_v6  ;;  %s975_s9 = smov 29   ;;  %s976_s10 = smov 33  }
  0x2c   : > { %v213_v4 = vld [vmem:[%s1116_s30] sm:$0xf]  ;;  %v253_v9 = vld [vmem:[%s1116_s30 + $0x4] sm:$0xf]  ;;  %s977_s11 = smov 35   ;;  %s978_s17 = smov 37  }
  0x2d   : > { %v220_v5 = vld [vmem:[%s1116_s30] sm:$0xf]  ;;  %v260_v10 = vld [vmem:[%s1116_s30 + $0x4] sm:$0xf]  ;;  %s979_s19 = smov 39   ;;  %s980_s20 = smov 45  }
  0x2e   : > { %v227_v7 = vld [vmem:[%s1116_s30] sm:$0xf]  ;;  %v267_v11 = vld [vmem:[%s1116_s30 + $0x4] sm:$0xf]  ;;  %s981_s22 = smov 41   ;;  %s982_s27 = smov 43  }
  0x2f   : > { %v246_v8 = vld [vmem:[%s1116_s30] sm:$0xf]  ;;  %v288_v12 = vld [vmem:[%s1116_s30 + $0x4] sm:$0xf]  ;;  %s983_s28 = smov 47   ;;  %s984_s29 = smov 49  }
  0x30   : > { %v274_v13 = vld [vmem:[%s1116_s30 + $0x4] sm:$0xf]  ;;  %vm211_vm3 = vcmask 576952   ;;  %vm218_vm4 = vcmask 724552   ;;  %vm225_vm5 = vcmask 872152   ;;  %vm242_vm6 = vcmask 1044472  }
  0x31   : > { %201 = vrot.lane.b32.xlu0 %v199_v3, %s971_s23  ;;  %v281_v14 = vld [vmem:[%s1116_s30 + $0x4] sm:$0xf]  ;;  %vm243_vm7 = vcmask 121860   ;;  %vm239_vm8 = vcmask 252928   ;;  %vm232_vm9 = vcmask 1019752   ;;  %vm251_vm11 = vcmask 265352  }
  0x32   : > { %215 = vrot.lane.b32.xlu1 %v213_v4, %s972_s7  ;;  %v300_v15 = vld [vmem:[%s1116_s30 + $0x4] sm:$0xf]  ;;  %vm244_vm10 = vmor %vm243_vm7, %vm242_vm6  ;;  %vm258_vm12 = vcmask 412952   ;;  %vm265_vm13 = vcmask 560552   ;;  %vm272_vm14 = vcmask 708152   ;;  %vm296_vm15 = vcmask 1044456  }
  0x33   : > { %222 = vrot.lane.b32.xlu2 %v220_v5, %s974_s8  ;;  %v307_v16 = vld [vmem:[%s1116_s30 + $0x4] sm:$0xf]  ;;  %vm297_vm0 = vcmask 105476   ;;  %vm312_vm6 = vcmask 396552   ;;  %s985_s30 = smov 126   ;;  %s986_s4 = smov 110  }
  0x34   : > { %s987_s5 = smov 109   ;;  %s988_s6 = smov 108   ;;  %vm469_vm7 = vcmask 736256  }
  0x35   : > { %s989_s23 = smov 91   ;;  %s990_s7 = smov 92  }
  0x36   : > { %s991_s8 = smov 90  }
  0x39   : > { %229 = vrot.lane.b32.xlu0 %v227_v7, %s975_s9  ;;  %s992_s9 = smov 127  }
  0x3a   : > { %248 = vrot.lane.b32.xlu1 %v246_v8, %s976_s10  ;;  %s1005_s10 = smov 114  }
  0x3b   : > { %255 = vrot.lane.b32.xlu2 %v253_v9, %s977_s11 }
  0x41   : > { %262 = vrot.lane.b32.xlu0 %v260_v10, %s978_s17 }
  0x42   : > { %269 = vrot.lane.b32.xlu1 %v267_v11, %s979_s19 }
  0x43   : > { %290 = vrot.lane.b32.xlu2 %v288_v12, %s980_s20  ;;  %s994_s20 = smov 120  }
  0x49   : > { %276 = vrot.lane.b32.xlu0 %v274_v13, %s981_s22  ;;  %s995_s22 = smov 124  }
  0x4a   : > { %283 = vrot.lane.b32.xlu1 %v281_v14, %s982_s27  ;;  %s996_s27 = smov 116  }
  0x4b   : > { %302 = vrot.lane.b32.xlu2 %v300_v15, %s983_s28  ;;  %s997_s28 = smov 118  }
  0x51   : > { %309 = vrot.lane.b32.xlu0 %v307_v16, %s984_s29  ;;  %s998_s29 = smov 122  }
  0x85   : > { %v237_v17 = vpop.permute.xlu2 %236 }
  0x86   : > { %v238_v23 = vrot.slane %v237_v17, 4 }
  0x88   : > { %v240_v27 = vsel %vm239_vm8, %v238_v23, %v237_v17  ;;  %v486_v17 = vld [vmem:[%s1270_s2] sm:$0xff]  ;;  %vm432_vm8 = vcmask 752640  }
  0x8d   : > { %v223_v20 = vpop.permute.xlu2 %222 }
  0x95   : > { %v256_v24 = vpop.permute.xlu2 %255 }
  0x9b   : > { %v195_v18 = vpop.permute.xlu0 %194 }
  0x9c   : > { %v209_v19 = vpop.permute.xlu1 %208  ;;  %198 = vst.msk [vmem:[#allocation2] sm:$0xf] %vm197_vm1, %v195_v18  ;;  %vm279_vm1 = vcmask 855752  }
  0x9d   : > { %v291_v30 = vpop.permute.xlu2 %290 }
  0x9e   : > { %v292_v31 = vrot.slane %v291_v30, 4 }
  0xa3   : > { %v202_v21 = vpop.permute.xlu0 %201 }
  0xa4   : > { %v216_v22 = vpop.permute.xlu1 %215  ;;  %205 = vst.msk [vmem:[#allocation2] sm:$0xf] %vm204_vm2, %v202_v21  ;;  %vm293_vm2 = vcmask 367616  }
  0xa5   : > { %212 = vst.msk [vmem:[#allocation2] sm:$0xf] %vm211_vm3, %v209_v19  ;;  %vm286_vm3 = vcmask 1003352   ;;  %v303_v34 = vpop.permute.xlu2 %302  ;;  %v294_v35 = vsel %vm293_vm2, %v292_v31, %v291_v30  ;;  %vm620_vm2 = vcmask 261120  }
  0xa6   : > { %219 = vst.msk [vmem:[#allocation2] sm:$0xf] %vm218_vm4, %v216_v22  ;;  %vm298_vm4 = vmor %vm297_vm0, %vm296_vm15  ;;  %vm340_vm15 = vcmask 1039360   ;;  %vm492_vm0 = vcmask 293888  }
  0xa7   : > { %226 = vst.msk [vmem:[#allocation2] sm:$0xf] %vm225_vm5, %v223_v20  ;;  %vm305_vm5 = vcmask 248952   ;;  %v993_v20 = vmov 0  }
  0xa8   : > { %869 = vset.pattern.permute.xlu0 %v993_v20 }
  0xab   : > { %v230_v25 = vpop.permute.xlu0 %229 }
  0xac   : > { %v249_v26 = vpop.permute.xlu1 %248  ;;  %233 = vst.msk [vmem:[#allocation2] sm:$0xf] %vm232_vm9, %v230_v25  ;;  %vm451_vm9 = vcmask 744448  }
  0xad   : > { %245 = vst.msk [vmem:[#allocation2] sm:$0xff] %vm244_vm10, %v240_v27  ;;  %vm414_vm10 = vcmask 883712  }
  0xae   : > { %252 = vst.msk [vmem:[#allocation2 + $0x4] sm:$0xf] %vm251_vm11, %v249_v26  ;;  %vm472_vm11 = vcmask 1043456  }
  0xaf   : > { %259 = vst.msk [vmem:[#allocation2 + $0x4] sm:$0xf] %vm258_vm12, %v256_v24  ;;  %vm395_vm12 = vcmask 891904  }
  0xb3   : > { %v263_v28 = vpop.permute.xlu0 %262 }
  0xb4   : > { %v270_v29 = vpop.permute.xlu1 %269  ;;  %266 = vst.msk [vmem:[#allocation2 + $0x4] sm:$0xf] %vm265_vm13, %v263_v28  ;;  %vm377_vm13 = vcmask 900096  }
  0xb5   : > { %273 = vst.msk [vmem:[#allocation2 + $0x4] sm:$0xf] %vm272_vm14, %v270_v29  ;;  %vm358_vm14 = vcmask 1031168  }
  0xbb   : > { %v277_v32 = vpop.permute.xlu0 %276 }
  0xbc   : > { %v284_v33 = vpop.permute.xlu1 %283  ;;  %280 = vst.msk [vmem:[#allocation2 + $0x4] sm:$0xf] %vm279_vm1, %v277_v32  ;;  %vm618_vm1 = vcmask 130048  }
  0xbd   : > { %287 = vst.msk [vmem:[#allocation2 + $0x4] sm:$0xf] %vm286_vm3, %v284_v33  ;;  %vm622_vm3 = vcmask 392192  }
  0xbe   : > { %299 = vst.msk [vmem:[#allocation2 + $0x4] sm:$0xff] %vm298_vm4, %v294_v35  ;;  %vm624_vm4 = vcmask 523264  }
  0xbf   : > { %306 = vst.msk [vmem:[#allocation2 + $0x8] sm:$0xf] %vm305_vm5, %v303_v34  ;;  %vm612_vm5 = vcmask 818176  }
  0xc3   : > { %v310_v36 = vpop.permute.xlu0 %309 }
  0xc4   : > { %313 = vst.msk [vmem:[#allocation2 + $0x8] sm:$0xf] %vm312_vm6, %v310_v36  ;;  %vm626_vm6 = vcmask 654336  }
  0xc5   : > { %v314_v37 = vld [vmem:[#allocation2] sm:$0xff] }
  0xc6   : > { %318 = vst [vmem:[#allocation1] ss:$2 sm:$0xff] %v314_v37 }
  0xcb   : > { %v1138_v38 = vld [vmem:[#allocation2 + $0x8] sm:$0xf] }
  0xcc   : > { %320 = vst [vmem:[#allocation1 + $0x10] ss:$2 sm:$0xff] %v1138_v38 }
  0xcd   : > { %v1141_v39 = vld.sshfl [vmem:[#allocation1] sm:$0xff pattern:$0x75316420]  ;;  %v1143_v40 = vld.sshfl [vmem:[#allocation1 + $0x8] sm:$0xff pattern:$0x75316420] }
  0xce   : > { %328 = vst [vmem:[#allocation1 + $0x1] ss:$2 sm:$0xff] %v314_v37 }
  0xd3   : > { %v1145_v41 = vld.sshfl [vmem:[#allocation1 + $0x10] sm:$0xff pattern:$0x75316420] }
  0xd4   : > { %330 = vst [vmem:[#allocation1 + $0x11] ss:$2 sm:$0xff] %v1138_v38 }
  0xd5   : > { %v1148_v42 = vld.sshfl [vmem:[#allocation1] sm:$0xff pattern:$0x75316420]  ;;  %v1150_v43 = vld.sshfl [vmem:[#allocation1 + $0x8] sm:$0xff pattern:$0x75316420] }
  0xd6   : > { %346 = vst [vmem:[#allocation1] ss:$2 sm:$0xff] %v314_v37 }
  0xdb   : > { %v1152_v44 = vld.sshfl [vmem:[#allocation1 + $0x10] sm:$0xff pattern:$0x75316420] }
  0xdc   : > { %348 = vst [vmem:[#allocation1 + $0x10] ss:$2 sm:$0xff] %v1138_v38  ;;  %v864_v45 = vpack.i.bf16 %v1148_v42, %v1152_v44 }
  0xdd   : > { %v350_v46 = vld.sshfl [vmem:[#allocation1 + $0x8] sm:$0xff pattern:$0x75316420]  ;;  %v349_v47 = vld.sshfl [vmem:[#allocation1] sm:$0xff pattern:$0x75316420] }
  0xde   : > { %354 = vrot.lane.b32.xlu2 %v350_v46, %s985_s30  ;;  %365 = vst [vmem:[#allocation1 + $0x1] ss:$2 sm:$0xff] %v314_v37 }
  0xe3   : > { %v351_v48 = vld.sshfl [vmem:[#allocation1 + $0x10] sm:$0xff pattern:$0x75316420] }
  0xe4   : > { %v834_v49 = vpack.i.bf16 %v349_v47, %v351_v48  ;;  %367 = vst [vmem:[#allocation1 + $0x11] ss:$2 sm:$0xff] %v1138_v38 }
  0xe5   : > { %v368_v50 = vld.sshfl [vmem:[#allocation1] sm:$0xff pattern:$0x75316420]  ;;  %v369_v51 = vld.sshfl [vmem:[#allocation1 + $0x8] sm:$0xff pattern:$0x75316420] }
  0xe6   : > { %835 = vrot.lane.b32.xlu0 %v834_v49, %s985_s30  ;;  %383 = vst [vmem:[#allocation1] ss:$2 sm:$0xff] %v314_v37 }
  0xeb   : > { %v370_v52 = vld.sshfl [vmem:[#allocation1 + $0x10] sm:$0xff pattern:$0x75316420] }
  0xec   : > { %v839_v53 = vpack.i.bf16 %v368_v50, %v370_v52  ;;  %385 = vst [vmem:[#allocation1 + $0x10] ss:$2 sm:$0xff] %v1138_v38 }
  0xed   : > { %v387_v54 = vld.sshfl [vmem:[#allocation1 + $0x8] sm:$0xff pattern:$0x75316420]  ;;  %v386_v55 = vld.sshfl [vmem:[#allocation1] sm:$0xff pattern:$0x75316420] }
  0xee   : > { %840 = vrot.lane.b32.xlu1 %v839_v53, %s986_s4  ;;  %402 = vst [vmem:[#allocation1 + $0x1] ss:$2 sm:$0xff] %v314_v37 }
  0xf3   : > { %v388_v56 = vld.sshfl [vmem:[#allocation1 + $0x10] sm:$0xff pattern:$0x75316420] }
  0xf4   : > { %v844_v57 = vpack.i.bf16 %v386_v55, %v388_v56  ;;  %404 = vst [vmem:[#allocation1 + $0x11] ss:$2 sm:$0xff] %v1138_v38 }
  0xf5   : > { %v405_v58 = vld.sshfl [vmem:[#allocation1] sm:$0xff pattern:$0x75316420]  ;;  %v406_v59 = vld.sshfl [vmem:[#allocation1 + $0x8] sm:$0xff pattern:$0x75316420] }
  0xf6   : > { %391 = vrot.lane.b32.xlu1 %v387_v54, %s987_s5  ;;  %845 = vrot.lane.b32.xlu2 %v844_v57, %s987_s5  ;;  %420 = vst [vmem:[#allocation1] ss:$2 sm:$0xff] %v314_v37  ;;  %s999_s5 = smov 112  }
  0xfb   : > { %v407_v60 = vld.sshfl [vmem:[#allocation1 + $0x10] sm:$0xff pattern:$0x75316420] }
  0xfc   : > { %v849_v61 = vpack.i.bf16 %v405_v58, %v407_v60  ;;  %422 = vst [vmem:[#allocation1 + $0x10] ss:$2 sm:$0xff] %v1138_v38 }
  0xfd   : > { %v423_v62 = vld.sshfl [vmem:[#allocation1] sm:$0xff pattern:$0x75316420]  ;;  %v424_v63 = vld.sshfl [vmem:[#allocation1 + $0x8] sm:$0xff pattern:$0x75316420] }
  0xfe   : > { %439 = vst [vmem:[#allocation1 + $0x1] ss:$2 sm:$0xff] %v314_v37  ;;  %410 = vrot.lane.b32.xlu2 %v406_v59, %s988_s6  ;;  %850 = vrot.lane.b32.xlu0 %v849_v61, %s988_s6 }
 0x103   : > { %v425_v0 = vld.sshfl [vmem:[#allocation1 + $0x10] sm:$0xff pattern:$0x75316420] }
 0x104   : > { %v854_v1 = vpack.i.bf16 %v423_v62, %v425_v0  ;;  %441 = vst [vmem:[#allocation1 + $0x11] ss:$2 sm:$0xff] %v1138_v38 }
 0x105   : > { %v442_v2 = vld.sshfl [vmem:[#allocation1] sm:$0xff pattern:$0x75316420]  ;;  %v443_v3 = vld.sshfl [vmem:[#allocation1 + $0x8] sm:$0xff pattern:$0x75316420] }
 0x106   : > { %447 = vrot.lane.b32.xlu1 %v443_v3, %s989_s23  ;;  %457 = vst [vmem:[#allocation1] ss:$2 sm:$0xff] %v314_v37  ;;  %428 = vrot.lane.b32.xlu0 %v424_v63, %s990_s7 }
 0x107   : > { %855 = vrot.lane.b32.xlu2 %v854_v1, %s990_s7  ;;  %s1001_s7 = smov 106  }
 0x10b   : > { %v444_v4 = vld.sshfl [vmem:[#allocation1 + $0x10] sm:$0xff pattern:$0x75316420] }
 0x10c   : > { %v859_v5 = vpack.i.bf16 %v442_v2, %v444_v4  ;;  %459 = vst [vmem:[#allocation1 + $0x10] ss:$2 sm:$0xff] %v1138_v38 }
 0x10d   : > { %v460_v6 = vld.sshfl [vmem:[#allocation1] sm:$0xff pattern:$0x75316420]  ;;  %v461_v7 = vld.sshfl [vmem:[#allocation1 + $0x8] sm:$0xff pattern:$0x75316420] }
 0x10e   : > { %463 = vrot.lane.b32.xlu1 %v460_v6, %s991_s8  ;;  %860 = vrot.lane.b32.xlu0 %v859_v5, %s989_s23  ;;  %s1000_s23 = smov 102  }
 0x10f   : > { %465 = vrot.lane.b32.xlu2 %v461_v7, %s991_s8  ;;  %v485_v7 = vld [vmem:[%s1269_s1] sm:$0xff] }
 0x113   : > { %v462_v8 = vld.sshfl [vmem:[#allocation1 + $0x10] sm:$0xff pattern:$0x75316420] }
 0x116   : > { %373 = vrot.lane.b32.xlu0 %v369_v51, %s986_s4  ;;  %467 = vrot.lane.b32.xlu1 %v462_v8, %s991_s8  ;;  %s1002_s8 = smov 104  }
 0x117   : > { %336 = vrot.lane.b32.xlu2 %v1150_v43, %s992_s9 }
 0x11e   : > { %865 = vrot.lane.b32.xlu1 %v864_v45, %s992_s9  ;;  %489 = vperm.xlu0 %869, %v486_v17   ;;  %s1004_s9 = smov 100  }
 0x138   : > { %v1173_v9 = vpop.permute.xlu2 %354 }
 0x150   : > { %v1175_v10 = vpop.permute.xlu2 %845 }
 0x151   : > { %v848_v28 = vunpack.i.h.bf16 %v1175_v10  ;;  %v847_v42 = vunpack.i.l.bf16 %v1175_v10 }
 0x158   : > { %v1179_v12 = vpop.permute.xlu0 %835  ;;  %v411_v13 = vpop.permute.xlu2 %410 }
 0x159   : > { %v838_v34 = vunpack.i.h.bf16 %v1179_v12  ;;  %v837_v43 = vunpack.i.l.bf16 %v1179_v12 }
 0x15b   : > { %v359_v51 = vsel %vm358_vm14, %v838_v34, %v1173_v9  ;;  %v360_v62 = vsel %vm358_vm14, %v1173_v9, %v837_v43 }
 0x160   : > { %v1177_v11 = vpop.permute.xlu1 %840 }
 0x161   : > { %v856_v16 = vpop.permute.xlu2 %855  ;;  %v843_v38 = vunpack.i.h.bf16 %v1177_v11  ;;  %v842_v48 = vunpack.i.l.bf16 %v1177_v11 }
 0x162   : > { %v858_v25 = vunpack.i.h.bf16 %v856_v16  ;;  %v857_v44 = vunpack.i.l.bf16 %v856_v16 }
 0x163   : > { %v478_v61 = vsel %vm472_vm11, %v837_v43, %v842_v48 }
 0x168   : > { %v392_v14 = vpop.permute.xlu1 %391 }
 0x169   : > { %v466_v21 = vpop.permute.xlu2 %465  ;;  %v396_v35 = vsel %vm395_vm12, %v848_v28, %v392_v14  ;;  %v397_v57 = vsel %vm395_vm12, %v392_v14, %v847_v42 }
 0x170   : > { %v851_v15 = vpop.permute.xlu0 %850 }
 0x171   : > { %v853_v22 = vunpack.i.h.bf16 %v851_v15  ;;  %v852_v36 = vunpack.i.l.bf16 %v851_v15  ;;  %v337_v3 = vpop.permute.xlu2 %336 }
 0x173   : > { %v415_v31 = vsel %vm414_vm10, %v853_v22, %v411_v13  ;;  %v416_v55 = vsel %vm414_vm10, %v411_v13, %v852_v36  ;;  %v481_v59 = vsel %vm472_vm11, %v847_v42, %v852_v36 }
 0x174   : > { %v479_v37 = vsel %vm472_vm11, %v396_v35, %v415_v31  ;;  %v480_v60 = vsel %vm472_vm11, %v397_v57, %v416_v55 }
 0x178   : > { %v448_v18 = vpop.permute.xlu1 %447  ;;  %v429_v19 = vpop.permute.xlu0 %428 }
 0x179   : > { %v433_v29 = vsel %vm432_vm8, %v858_v25, %v429_v19  ;;  %v434_v52 = vsel %vm432_vm8, %v429_v19, %v857_v44  ;;  %vm628_vm8 = vcmask 785408  }
 0x180   : > { %v464_v23 = vpop.permute.xlu1 %463  ;;  %v861_v24 = vpop.permute.xlu0 %860 }
 0x181   : > { %v863_v26 = vunpack.i.h.bf16 %v861_v24  ;;  %v470_v27 = vsel %vm469_vm7, %v464_v23, %v466_v21  ;;  %v862_v32 = vunpack.i.l.bf16 %v861_v24 }
 0x182   : > { %737 = vmatpush.msk.msra.mxu0 %vm472_vm11, %v470_v27 }
 0x183   : > { %v452_v30 = vsel %vm451_vm9, %v863_v26, %v448_v18  ;;  %v453_v47 = vsel %vm451_vm9, %v448_v18, %v862_v32  ;;  %v484_v54 = vsel %vm472_vm11, %v857_v44, %v862_v32  ;;  %vm586_vm9 = vcmask 932864  }
 0x184   : > { %v482_v33 = vsel %vm472_vm11, %v433_v29, %v452_v30  ;;  %v483_v56 = vsel %vm472_vm11, %v434_v52, %v453_v47 }
 0x185   : > { %514 = vmatpush.msra.mxu0 %v482_v33 }
 0x187   : > { %515 = vmatpush.msra.mxu0 %v479_v37 }
 0x188   : > { %v374_v45 = vpop.permute.xlu0 %373  ;;  %v468_v46 = vpop.permute.xlu1 %467 }
 0x189   : > { %v378_v49 = vsel %vm377_vm13, %v843_v38, %v374_v45  ;;  %741 = vmatpush.msk.msra.mxu2 %vm472_vm11, %v468_v46  ;;  %v471_v50 = vsel %vm469_vm7, %v466_v21, %v468_v46  ;;  %v379_v58 = vsel %vm377_vm13, %v374_v45, %v842_v48  ;;  %vm630_vm7 = vcmask 916480  }
 0x18a   : > { %739 = vmatpush.msk.msra.mxu1 %vm472_vm11, %v471_v50  ;;  %v476_v53 = vsel %vm472_vm11, %v359_v51, %v378_v49  ;;  %v477_v63 = vsel %vm472_vm11, %v360_v62, %v379_v58 }
 0x18b   : > { %516 = vmatpush.msra.mxu0 %v476_v53  ;;  %554 = vmatpush.msra.mxu2 %v484_v54 }
 0x18c   : > { %534 = vmatpush.msra.mxu1 %v483_v56 }
 0x18d   : > { %555 = vmatpush.msra.mxu2 %v481_v59 }
 0x18e   : > { %535 = vmatpush.msra.mxu1 %v480_v60 }
 0x18f   : > { %556 = vmatpush.msra.mxu2 %v478_v61 }
 0x190   : > { %536 = vmatpush.msra.mxu1 %v477_v63  ;;  %v866_v0 = vpop.permute.xlu1 %865 }
 0x191   : > { %v868_v1 = vunpack.i.h.bf16 %v866_v0  ;;  %v867_v2 = vunpack.i.l.bf16 %v866_v0 }
 0x193   : > { %v475_v4 = vsel %vm472_vm11, %v1145_v41, %v867_v2  ;;  %v341_v5 = vsel %vm340_vm15, %v868_v1, %v337_v3  ;;  %v342_v6 = vsel %vm340_vm15, %v337_v3, %v867_v2  ;;  %v490_v41 = vpop.permute.xlu0 %489 }
 0x194   : > { %557 = vmatpush.msra.mxu2 %v475_v4  ;;  %v473_v8 = vsel %vm472_vm11, %v1141_v39, %v341_v5  ;;  %v474_v9 = vsel %vm472_vm11, %v1143_v40, %v342_v6 }
 0x195   : > { %517 = vmatpush.msra.mxu0 %v473_v8  ;;  %537 = vmatpush.msra.mxu1 %v474_v9 }
 0x196   : > { %742 = vmatmul.msk.f32.vlgmr.msra.gmra.mxu2 %vm492_vm0, %v485_v7  ;;  %738 = vmatmul.msk.f32.vlgmr.msra.gmra.mxu0 %vm492_vm0, %v485_v7 }
 0x197   : > { %740 = vmatmul.msk.f32.vlgmr.msra.gmra.mxu1 %vm492_vm0, %v485_v7 }
 0x213   : > { %v519_v10 = vpop.f32.mrf.mxu0 }
 0x214   : > { %v520_v11 = vadd.f32 %v519_v10, %v490_v41  ;;  %v539_v39 = vpop.f32.mrf.mxu1 }
 0x215   : > { %v540_v40 = vadd.f32 %v539_v39, %v490_v41 }
 0x216   : > { %572 = vrot.lane.b32.xlu0 %v520_v11, %s994_s20  ;;  %566 = vrot.lane.b32.xlu2 %v520_v11, %s995_s22 }
 0x217   : > { %563 = vrot.lane.b32.xlu1 %v520_v11, %s985_s30  ;;  %s1003_s30 = smov 98  }
 0x219   : > { %v559_v12 = vpop.f32.mrf.mxu2 }
 0x21a   : > { %v560_v13 = vadd.f32 %v559_v12, %v490_v41 }
 0x21e   : > { %578 = vrot.lane.b32.xlu0 %v520_v11, %s996_s27  ;;  %575 = vrot.lane.b32.xlu2 %v520_v11, %s997_s28  ;;  %s642_s27 = scalar_lea.sflag [#allocation5], %s1112_s26 }
 0x21f   : > { %569 = vrot.lane.b32.xlu1 %v520_v11, %s998_s29 }
 0x226   : > { %595 = vrot.lane.b32.xlu0 %v540_v40, %s988_s6  ;;  %592 = vrot.lane.b32.xlu2 %v540_v40, %s986_s4  ;;  %s736_s4 = sshll.u32 %s1112_s26, 4  ;;  %s749_s6 = sshll.u32 %s1047_s16, 4 }
 0x227   : > { %589 = vrot.lane.b32.xlu1 %v540_v40, %s999_s5  ;;  %s653_s19 = scalar_lea.hbm %s1271_s3, %s749_s6  ;;  %s188_s20 = scalar_lea.vmem [#allocation6], %s736_s4 }
 0x228   : > { %s655_s16 = sshll.u32 %s188_s20, 4  ;;  %s657_s22 = sshll.u32 %s653_s19, 4  ;;  %s656_s16 = int_to_ptr.vmem [resolvable:$true] %s655_s16  ;;  %s658_s22 = int_to_ptr.hbm [resolvable:$true] %s657_s22 }
 0x229   : > { %s914_s28 = sshra.s32 %s658_s22, 4  ;;  %s915_s28 = int_to_ptr.hbm [resolvable:$true] %s914_s28 }
 0x22a   : > { %s916_s29 = scalar_lea.hbm %s915_s28, 16  ;;  %p921_p0 = scmp.lt.s32.totalorder %s915_s28, %s1271_s3 }
 0x22b   : > { %p917_p6 = scmp.ne.s32.totalorder %s915_s28, %s916_s29 }
 0x22d   : > { %p918_p9 = pnand %p917_p6, %p1076_p11 }
 0x22e   : > { %604 = vrot.lane.b32.xlu0 %v540_v40, %s1000_s23  ;;  %598 = vrot.lane.b32.xlu2 %v540_v40, %s1001_s7  ;;  %s920_s7 = scalar_lea.hbm %s1271_s3, 32 }
 0x22f   : > { %601 = vrot.lane.b32.xlu1 %v540_v40, %s1002_s8  ;;  %p919_p13 = pneg %p918_p9  ;;  %p922_p1 = scmp.lt.s32.totalorder %s920_s7, %s916_s29 }
 0x231   : > { %p923_p3 = por %p922_p1, %p921_p0 }
 0x233   : > { %p924_p4 = pnand %p923_p3, %p919_p13 }
 0x236   : > { %615 = vrot.lane.b32.xlu0 %v560_v13, %s1003_s30  ;;  %610 = vrot.lane.b32.xlu2 %v560_v13, %s1004_s9 }
 0x237   : > { %608 = vrot.lane.b32.xlu1 %v540_v40, %s1004_s9 }
 0x23e   : > { %584 = vrot.lane.b32.xlu2 %v540_v40, %s1005_s10 }
 0x23f   : > { %582 = vrot.lane.b32.xlu1 %v520_v11, %s1005_s10 }
 0x270   : > { %v567_v14 = vpop.permute.xlu2 %566 }
 0x278   : > { %v576_v16 = vpop.permute.xlu2 %575 }
 0x280   : > { %v593_v20 = vpop.permute.xlu2 %592 }
 0x288   : > { %v573_v15 = vpop.permute.xlu0 %572  ;;  %v599_v23 = vpop.permute.xlu2 %598 }
 0x289   : > { %v564_v17 = vpop.permute.xlu1 %563 }
 0x28a   : > { %v619_v28 = vsel %vm618_vm1, %v520_v11, %v564_v17 }
 0x28b   : > { %v621_v32 = vsel %vm620_vm2, %v619_v28, %v567_v14 }
 0x290   : > { %v579_v18 = vpop.permute.xlu0 %578  ;;  %v611_v30 = vpop.permute.xlu2 %610 }
 0x291   : > { %v570_v19 = vpop.permute.xlu1 %569 }
 0x292   : > { %v623_v33 = vsel %vm622_vm3, %v621_v32, %v570_v19 }
 0x293   : > { %v625_v42 = vsel %vm624_vm4, %v623_v33, %v573_v15 }
 0x294   : > { %v627_v44 = vsel %vm626_vm6, %v625_v42, %v576_v16 }
 0x295   : > { %v629_v47 = vsel %vm628_vm8, %v627_v44, %v579_v18 }
 0x298   : > { %v596_v21 = vpop.permute.xlu0 %595  ;;  %v585_v45 = vpop.permute.xlu2 %584 }
 0x299   : > { %v590_v22 = vpop.permute.xlu1 %589 }
 0x29a   : > { %v632_v24 = vsel %vm618_vm1, %v590_v22, %v593_v20 }
 0x29b   : > { %v633_v27 = vsel %vm620_vm2, %v632_v24, %v596_v21 }
 0x29c   : > { %v634_v29 = vsel %vm622_vm3, %v633_v27, %v599_v23 }
 0x2a0   : > { %v605_v25 = vpop.permute.xlu0 %604 }
 0x2a1   : > { %v602_v26 = vpop.permute.xlu1 %601 }
 0x2a2   : > { %v635_v31 = vsel %vm624_vm4, %v634_v29, %v602_v26 }
 0x2a3   : > { %v636_v35 = vsel %vm626_vm6, %v635_v31, %v605_v25 }
 0x2a8   : > { %v616_v37 = vpop.permute.xlu0 %615 }
 0x2a9   : > { %v609_v34 = vpop.permute.xlu1 %608 }
 0x2aa   : > { %v613_v36 = vsel %vm612_vm5, %v609_v34, %v611_v30 }
 0x2ab   : > { %v637_v38 = vsel %vm628_vm8, %v636_v35, %v613_v36 }
 0x2ac   : > { %v638_v43 = vsel %vm630_vm7, %v637_v38, %v616_v37 }
 0x2ad   : > { %640 = vst [vmem:[%s188_s20 + $0x8] sm:$0xff] %v638_v43 }
 0x2b1   : > { %v583_v46 = vpop.permute.xlu1 %582 }
 0x2b2   : > { %v587_v48 = vsel %vm586_vm9, %v583_v46, %v585_v45 }
 0x2b3   : > { %v631_v49 = vsel %vm630_vm7, %v629_v47, %v587_v48 }
 0x2b4   : > { %639 = vst [vmem:[%s188_s20] sm:$0xff] %v631_v49 }
 0x2b5   : > { %927 = shalt.err (!%p924_p4)
}
 0x2b6   : > { %752 = dma.vmem_to_hbm [thread:$0]  (%p1076_p11), %s656_s16, 256, %s658_s22, %s642_s27  }
 0x2b7 PF: > { %s669_s26 = sand.u32 1, %s954_s12   ;;  %p1277_p7 = scmp.ge.s32.totalorder %s966_s15, 2 }
 0x2b8   : > { %s670_s9 = scalar_lea.sflag [#allocation5], %s669_s26 }
 0x2b9   : > { %p759_p5 = pnand %p1277_p7, %p1080_p12 }
 0x2bb   : > { %p760_p8 = pneg %p759_p5 }
 0x2bd   : > { %949 = dma.done.wait (%p760_p8), %s670_s9, 256  }
 0x2be   : > { %951 = vsyncadd (%p760_p8), %s670_s9, 4294967040  ;;  %p16_p10 = scmp.ge.s32.totalorder %s1051_s18, 4   ;;  %s1278_s12 = smov %s958_s13 }
 0x2bf   : > { %s1279_s13 = smov %s962_s14  ;;  %s1280_s14 = smov %s1063_s21 }
 0x2c0   : > { %s1281_s15 = smov %s1051_s18  ;;  %18 = sbr.rel (!%p16_p10) target bundleno = 5 (0x5), region = 90 }
 0x2c5   :  { %676 = vsyncpa [#allocation4], 1 }
 0x2c6   :  { %678 = vsyncpa [#allocation4 + $0x1], 1 }
 0x2c7   :  { %679 = vsyncpa [#allocation5], 1 }
 0x2c8   :  { %681 = vsyncpa [#allocation5 + $0x1], 1 }

</bundles_post_ra>
